<compile_context>
chip_gen: v7x
topology: tpu7x:2x2x1
jax: 0.10.0
libtpu: 0.0.40
codegen_flags: <defaults>
</compile_context>

<pallas_src>
import jax
import jax.numpy as jnp
from jax.experimental import pallas as pl
from jax.experimental.pallas import tpu as pltpu

_LANES = 128          # TPU vreg lane width
_MAX_BLOCK_ROWS = 512 # ~85% of HBM roofline for elementwise tiles


def _model2_kernel(a_ref, b_ref, c_ref, a1_ref, b1_ref, c1_ref):
    # relu — scalar constant avoids materializing a broadcast vreg
    a1_ref[...] = jnp.maximum(a_ref[...], 0.0)
    # sigmoid via tanh: sigmoid(x) = 0.5 * (tanh(x/2) + 1)  (EUP slot, no divide)
    b = b_ref[...]
    b1_ref[...] = 0.5 * (jnp.tanh(0.5 * b) + 1.0)
    # tanh (EUP)
    c1_ref[...] = jnp.tanh(c_ref[...])


def model2_forward(a, b, c):
    """Fused relu/sigmoid/tanh over three same-shaped tensors."""
    assert a.shape == b.shape == c.shape, "Model2 inputs are elementwise-same-shaped"
    orig_shape = a.shape
    total = 1
    for d in orig_shape:
        total *= d

    # Lane-dense 2D view: (rows, 128). Pure row-major reshape -> exact NCHW
    # element order is preserved when reshaping back.
    if total % _LANES == 0:
        rows = total // _LANES
        view_shape = (rows, _LANES)
    else:
        # Fallback (lane-sparse but correct) for odd sizes.
        rows = 1
        view_shape = (1, total)

    a2 = a.reshape(view_shape)
    b2 = b.reshape(view_shape)
    c2 = c.reshape(view_shape)

    # Row tiling: full array when small, otherwise 512-row (8-aligned) tiles.
    block_rows = rows if rows <= _MAX_BLOCK_ROWS else _MAX_BLOCK_ROWS
    grid = (pl.cdiv(rows, block_rows),)
    spec = pl.BlockSpec((block_rows, view_shape[1]), lambda i: (i, 0))

    out_shapes = tuple(jax.ShapeDtypeStruct(view_shape, a.dtype) for _ in range(3))

    a1, b1, c1 = pl.pallas_call(
        _model2_kernel,
        out_shape=out_shapes,
        grid=grid,
        in_specs=[spec, spec, spec],
        out_specs=(spec, spec, spec),
        compiler_params=pltpu.CompilerParams(
            dimension_semantics=("parallel",),
            vmem_limit_bytes=32 << 20,  # safe on v5e (16 MiB default) and v7x (64 MiB phys)
        ),
    )(a2, b2, c2)

    return (
        a1.reshape(orig_shape),
        b1.reshape(orig_shape),
        c1.reshape(orig_shape),
    )


if __name__ == "__main__":
    key = jax.random.PRNGKey(0)
    ka, kb, kc = jax.random.split(key, 3)
    # Small NCHW-style shapes consistent with generic elementwise inputs.
    a = jax.random.normal(ka, (2, 4, 16, 16), dtype=jnp.float32)
    b = jax.random.normal(kb, (2, 4, 16, 16), dtype=jnp.float32)
    c = jax.random.normal(kc, (2, 4, 16, 16), dtype=jnp.float32)

    a1, b1, c1 = model2_forward(a, b, c)
    jax.block_until_ready((a1, b1, c1))

    # Correctness check against plain-JAX reference.
    assert jnp.allclose(a1, jax.nn.relu(a), atol=1e-6)
    assert jnp.allclose(b1, jax.nn.sigmoid(b), atol=1e-6)
    assert jnp.allclose(c1, jnp.tanh(c), atol=1e-6)

    print("KERNEL_OK")
</pallas_src>

<mosaic_0001>
module attributes {stable_mosaic.version = 11 : i64} {
  func.func @_model2_kernel(%arg0: i32, %arg1: memref<16x128xf32, #tpu.memory_space<vmem>>, %arg2: memref<16x128xf32, #tpu.memory_space<vmem>>, %arg3: memref<16x128xf32, #tpu.memory_space<vmem>>, %arg4: memref<16x128xf32, #tpu.memory_space<vmem>>, %arg5: memref<16x128xf32, #tpu.memory_space<vmem>>, %arg6: memref<16x128xf32, #tpu.memory_space<vmem>>) attributes {dimension_semantics = [#tpu.dimension_semantics<parallel>], iteration_bounds = array<i64: 1>, scalar_prefetch = 0 : i64, scratch_operands = 0 : i64, tpu.core_type = #tpu.core_type<tc>, window_params = [{transform_indices = @transform_0, window_bounds = array<i64: 16, 128>}, {transform_indices = @transform_1, window_bounds = array<i64: 16, 128>}, {transform_indices = @transform_2, window_bounds = array<i64: 16, 128>}, {transform_indices = @transform_3, window_bounds = array<i64: 16, 128>}, {transform_indices = @transform_4, window_bounds = array<i64: 16, 128>}, {transform_indices = @transform_5, window_bounds = array<i64: 16, 128>}]} {
    %c0 = arith.constant 0 : index
    %c0_0 = arith.constant 0 : index
    %0 = vector.load %arg1[%c0, %c0_0] : memref<16x128xf32, #tpu.memory_space<vmem>>, vector<16x128xf32>
    %cst = arith.constant 0.000000e+00 : f32
    %1 = vector.broadcast %cst : f32 to vector<16x128xf32>
    %2 = arith.maximumf %0, %1 : vector<16x128xf32>
    %c0_1 = arith.constant 0 : index
    %c0_2 = arith.constant 0 : index
    %3 = vector.load %arg4[%c0_1, %c0_2] : memref<16x128xf32, #tpu.memory_space<vmem>>, vector<16x128xf32>
    tpu.vector_store %arg4[%c0_1, %c0_2], %2 {strides = array<i32>} : memref<16x128xf32, #tpu.memory_space<vmem>>, vector<16x128xf32>,
    %c0_3 = arith.constant 0 : index
    %c0_4 = arith.constant 0 : index
    %4 = vector.load %arg2[%c0_3, %c0_4] : memref<16x128xf32, #tpu.memory_space<vmem>>, vector<16x128xf32>
    %cst_5 = arith.constant 5.000000e-01 : f32
    %5 = vector.broadcast %cst_5 : f32 to vector<16x128xf32>
    %6 = arith.mulf %5, %4 : vector<16x128xf32>
    %7 = math.tanh %6 : vector<16x128xf32>
    %cst_6 = arith.constant 1.000000e+00 : f32
    %8 = vector.broadcast %cst_6 : f32 to vector<16x128xf32>
    %9 = arith.addf %7, %8 : vector<16x128xf32>
    %cst_7 = arith.constant 5.000000e-01 : f32
    %10 = vector.broadcast %cst_7 : f32 to vector<16x128xf32>
    %11 = arith.mulf %10, %9 : vector<16x128xf32>
    %c0_8 = arith.constant 0 : index
    %c0_9 = arith.constant 0 : index
    %12 = vector.load %arg5[%c0_8, %c0_9] : memref<16x128xf32, #tpu.memory_space<vmem>>, vector<16x128xf32>
    tpu.vector_store %arg5[%c0_8, %c0_9], %11 {strides = array<i32>} : memref<16x128xf32, #tpu.memory_space<vmem>>, vector<16x128xf32>,
    %c0_10 = arith.constant 0 : index
    %c0_11 = arith.constant 0 : index
    %13 = vector.load %arg3[%c0_10, %c0_11] : memref<16x128xf32, #tpu.memory_space<vmem>>, vector<16x128xf32>
    %14 = math.tanh %13 : vector<16x128xf32>
    %c0_12 = arith.constant 0 : index
    %c0_13 = arith.constant 0 : index
    %15 = vector.load %arg6[%c0_12, %c0_13] : memref<16x128xf32, #tpu.memory_space<vmem>>, vector<16x128xf32>
    tpu.vector_store %arg6[%c0_12, %c0_13], %14 {strides = array<i32>} : memref<16x128xf32, #tpu.memory_space<vmem>>, vector<16x128xf32>,
    return
  }
  func.func @transform_0(%arg0: i32) -> (i32, i32) {
    %c0_i32 = arith.constant 0 : i32
    %c0_i32_0 = arith.constant 0 : i32
    return %arg0, %c0_i32 : i32, i32
  }
  func.func @transform_1(%arg0: i32) -> (i32, i32) {
    %c0_i32 = arith.constant 0 : i32
    %c0_i32_0 = arith.constant 0 : i32
    return %arg0, %c0_i32 : i32, i32
  }
  func.func @transform_2(%arg0: i32) -> (i32, i32) {
    %c0_i32 = arith.constant 0 : i32
    %c0_i32_0 = arith.constant 0 : i32
    return %arg0, %c0_i32 : i32, i32
  }
  func.func @transform_3(%arg0: i32) -> (i32, i32) {
    %c0_i32 = arith.constant 0 : i32
    %c0_i32_0 = arith.constant 0 : i32
    return %arg0, %c0_i32 : i32, i32
  }
  func.func @transform_4(%arg0: i32) -> (i32, i32) {
    %c0_i32 = arith.constant 0 : i32
    %c0_i32_0 = arith.constant 0 : i32
    return %arg0, %c0_i32 : i32, i32
  }
  func.func @transform_5(%arg0: i32) -> (i32, i32) {
    %c0_i32 = arith.constant 0 : i32
    %c0_i32_0 = arith.constant 0 : i32
    return %arg0, %c0_i32 : i32, i32
  }
}

</mosaic_0001>

<bundles_post_ra>
// kernel: tpu_custom_call.1
= control target key start
LH: loop header
LB: loop body
LE: loop exit
PB: predicated region body
PF: predicated region fallthrough
CT: control target
= control target key end

     0   :  { %11 = vsyncpa [#allocation3], 0  ;;  %s431_s0 = inlined_call_operand.hbm [shape: f32[16,128], index: 0, kind: input, shape index: {}]   ;;  %s432_s1 = inlined_call_operand.hbm [shape: f32[16,128], index: 1, kind: input, shape index: {}]   ;;  %s433_s2 = inlined_call_operand.hbm [shape: f32[16,128], index: 2, kind: input, shape index: {}]   ;;  %s434_s3 = inlined_call_operand.hbm [shape: f32[16,128], index: 3, kind: output, shape index: {0}]   ;;  %s435_s4 = inlined_call_operand.hbm [shape: f32[16,128], index: 4, kind: output, shape index: {1}]   ;;  %s436_s5 = inlined_call_operand.hbm [shape: f32[16,128], index: 5, kind: output, shape index: {2}]  }
   0x1   :  { %12 = vsyncpa [#allocation6], 0 }
   0x2   :  { %13 = vsyncpa [#allocation4], 0 }
   0x3   :  { %14 = vsyncpa [#allocation10], 0  ;;  %s289_s18 = smov [#allocation5]   ;;  %s290_s20 = smov [#allocation2]  }
   0x4   :  { %s32_s19 = sshll.u32 %s289_s18, 4  ;;  %s20_s21 = sshll.u32 %s290_s20, 4  ;;  %s33_s19 = int_to_ptr.vmem [resolvable:$true] %s32_s19  ;;  %s327_s21 = int_to_ptr.vmem [resolvable:$true] %s20_s21 }
   0x5   :  { %s149_s24 = scalar_lea.hbm %s432_s1, 256 }
   0x6   :  { %p150_p0 = scmp.ne.s32.totalorder %s432_s1, %s149_s24  ;;  %p153_p1 = scmp.lt.u32.totalorder %s149_s24, %s432_s1 }
   0x8   :  { %p155_p2 = pnand %p153_p1, %p150_p0 }
   0xa   :  { %158 = shalt.err (!%p155_p2)
}
   0xb   :  { %s159_s29 = scalar_lea.vmem %s33_s19, 256  ;;  %p164_p4 = scmp.lt.s32.totalorder %s33_s19, %s33_s19 }
   0xc   :  { %p160_p3 = scmp.ne.s32.totalorder %s33_s19, %s159_s29  ;;  %p165_p5 = scmp.lt.s32.totalorder %s159_s29, %s159_s29 }
   0xe   :  { %p166_p6 = por %p165_p5, %p164_p4 }
  0x10   :  { %p167_p7 = pnand %p166_p6, %p160_p3 }
  0x12   :  { %170 = shalt.err (!%p167_p7)
}
  0x13   :  { %s291_s30 = smov 128   ;;  %s292_s6 = smov 8  }
  0x14   :  { %38 = dma.hbm_to_vmem [thread:$0]  %s432_s1, 256, %s33_s19, [#allocation6], %s291_s30, %s291_s30, %s292_s6  }
  0x15   :  { %s171_s11 = scalar_lea.hbm %s431_s0, 256 }
  0x16   :  { %p172_p8 = scmp.ne.s32.totalorder %s431_s0, %s171_s11  ;;  %p175_p9 = scmp.lt.u32.totalorder %s171_s11, %s431_s0 }
  0x18   :  { %p177_p10 = pnand %p175_p9, %p172_p8 }
  0x1a   :  { %180 = shalt.err (!%p177_p10)
}
  0x1b   :  { %s181_s16 = scalar_lea.vmem %s327_s21, 256  ;;  %p186_p12 = scmp.lt.s32.totalorder %s327_s21, %s327_s21 }
  0x1c   :  { %p182_p11 = scmp.ne.s32.totalorder %s327_s21, %s181_s16  ;;  %p187_p13 = scmp.lt.s32.totalorder %s181_s16, %s181_s16 }
  0x1e   :  { %p188_p0 = por %p187_p13, %p186_p12 }
  0x20   :  { %p189_p1 = pnand %p188_p0, %p182_p11 }
  0x22   :  { %192 = shalt.err (!%p189_p1)
}
  0x23   :  { %26 = dma.hbm_to_vmem [thread:$0]  %s431_s0, 256, %s327_s21, [#allocation3], %s291_s30, %s291_s30, %s292_s6  }
  0x24   :  { %s293_s18 = smov [#allocation7]   ;;  %s193_s23 = scalar_lea.hbm %s433_s2, 256 }
  0x25   :  { %s44_s19 = sshll.u32 %s293_s18, 4  ;;  %p194_p2 = scmp.ne.s32.totalorder %s433_s2, %s193_s23  ;;  %s45_s19 = int_to_ptr.vmem [resolvable:$true] %s44_s19 }
  0x26   :  { %p197_p3 = scmp.lt.u32.totalorder %s193_s23, %s433_s2 }
  0x28   :  { %p199_p4 = pnand %p197_p3, %p194_p2 }
  0x2a   :  { %202 = shalt.err (!%p199_p4)
}
  0x2b   :  { %s203_s28 = scalar_lea.vmem %s45_s19, 256  ;;  %p208_p6 = scmp.lt.s32.totalorder %s45_s19, %s45_s19 }
  0x2c   :  { %p204_p5 = scmp.ne.s32.totalorder %s45_s19, %s203_s28  ;;  %p209_p7 = scmp.lt.s32.totalorder %s203_s28, %s203_s28 }
  0x2e   :  { %p210_p8 = por %p209_p7, %p208_p6 }
  0x30   :  { %p211_p9 = pnand %p210_p8, %p204_p5 }
  0x32   :  { %214 = shalt.err (!%p211_p9)
}
  0x33   :  { %50 = dma.hbm_to_vmem [thread:$0]  %s433_s2, 256, %s45_s19, [#allocation6], %s291_s30, %s291_s30, %s292_s6  }
  0x34   :  { %281 = dma.done.wait [#allocation3], 256  }
  0x35   :  { %282 = vsyncadd [#allocation3], 4294967040 }
  0x36   :  { %283 = dma.done.wait [#allocation6], 512  }
  0x37   :  { %284 = vsyncadd [#allocation6], 4294966784  ;;  %s294_s29 = smov [#allocation8]   ;;  %v66_v0 = vld [vmem:[#allocation5] sm:$0xff]  ;;  %v67_v1 = vld [vmem:[#allocation5 + $0x8] sm:$0xff] }
  0x38   :  { %s89_s7 = sshll.u32 %s294_s29, 4  ;;  %v60_v2 = vld [vmem:[#allocation2] sm:$0xff]  ;;  %v68_v3 = vmul.f32 0.5, %v66_v0  ;;  %v69_v4 = vmul.f32 0.5, %v67_v1  ;;  %v61_v6 = vld [vmem:[#allocation2 + $0x8] sm:$0xff]  ;;  %s90_s7 = int_to_ptr.vmem [resolvable:$true] %s89_s7 }
  0x39   :  { %v62_v5 = vmax.f32 %v60_v2, 0.0  ;;  %v78_v7 = vld [vmem:[#allocation7] sm:$0xff]  ;;  %v63_v8 = vmax.f32 %v61_v6, 0.0  ;;  %v79_v9 = vld [vmem:[#allocation7 + $0x8] sm:$0xff]  ;;  %s215_s2 = scalar_lea.vmem %s90_s7, 256  ;;  %p220_p11 = scmp.lt.s32.totalorder %s90_s7, %s90_s7 }
  0x3a   :  { %141 = vtanh.f32 %v78_v7  ;;  %p216_p10 = scmp.ne.s32.totalorder %s90_s7, %s215_s2  ;;  %p221_p12 = scmp.lt.s32.totalorder %s215_s2, %s215_s2 }
  0x3b   :  { %143 = vtanh.f32 %v68_v3  ;;  %64 = vst [vmem:[#allocation8] sm:$0xff] %v62_v5  ;;  %65 = vst [vmem:[#allocation8 + $0x8] sm:$0xff] %v63_v8 }
  0x3c   :  { %145 = vtanh.f32 %v69_v4  ;;  %p222_p13 = por %p221_p12, %p220_p11 }
  0x3d   :  { %147 = vtanh.f32 %v79_v9 }
  0x3e   :  { %p223_p0 = pnand %p222_p13, %p216_p10 }
  0x40   :  { %226 = shalt.err (!%p223_p0)
}
  0x41   :  { %s227_s10 = scalar_lea.hbm %s434_s3, 256 }
  0x42   :  { %p228_p1 = scmp.ne.s32.totalorder %s434_s3, %s227_s10  ;;  %p231_p2 = scmp.lt.u32.totalorder %s227_s10, %s434_s3 }
  0x44   :  { %p233_p3 = pnand %p231_p2, %p228_p1 }
  0x46   :  { %236 = shalt.err (!%p233_p3)
}
  0x47   :  { %95 = dma.vmem_to_hbm [thread:$0]  %s90_s7, 256, %s434_s3, [#allocation4], %s291_s30, %s291_s30, %s292_s6   ;;  %v142_v10 = vpop.eup %141 }
  0x48   :  { %v144_v11 = vpop.eup %143  ;;  %82 = vst [vmem:[#allocation11] sm:$0xff] %v142_v10  ;;  %s295_s1 = smov [#allocation9]   ;;  %s296_s18 = smov [#allocation11]  }
  0x49   :  { %v146_v12 = vpop.eup %145  ;;  %v72_v13 = vadd.f32 1.0, %v144_v11  ;;  %s101_s17 = sshll.u32 %s295_s1, 4  ;;  %s113_s19 = sshll.u32 %s296_s18, 4  ;;  %s102_s17 = int_to_ptr.vmem [resolvable:$true] %s101_s17  ;;  %s394_s19 = int_to_ptr.vmem [resolvable:$true] %s113_s19 }
  0x4a   :  { %v148_v14 = vpop.eup %147  ;;  %v73_v15 = vadd.f32 1.0, %v146_v12  ;;  %s237_s3 = scalar_lea.vmem %s102_s17, 256  ;;  %p242_p5 = scmp.lt.s32.totalorder %s102_s17, %s102_s17 }
  0x4b   :  { %v74_v16 = vmul.f32 0.5, %v72_v13  ;;  %83 = vst [vmem:[#allocation11 + $0x8] sm:$0xff] %v148_v14  ;;  %p238_p4 = scmp.ne.s32.totalorder %s102_s17, %s237_s3  ;;  %p243_p6 = scmp.lt.s32.totalorder %s237_s3, %s237_s3 }
  0x4c   :  { %v75_v17 = vmul.f32 0.5, %v73_v15 }
  0x4d   :  { %76 = vst [vmem:[#allocation9] sm:$0xff] %v74_v16  ;;  %p244_p7 = por %p243_p6, %p242_p5 }
  0x4e   :  { %77 = vst [vmem:[#allocation9 + $0x8] sm:$0xff] %v75_v17 }
  0x4f   :  { %p245_p8 = pnand %p244_p7, %p238_p4 }
  0x51   :  { %248 = shalt.err (!%p245_p8)
}
  0x52   :  { %s249_s23 = scalar_lea.hbm %s435_s4, 256 }
  0x53   :  { %p250_p9 = scmp.ne.s32.totalorder %s435_s4, %s249_s23  ;;  %p253_p10 = scmp.lt.u32.totalorder %s249_s23, %s435_s4 }
  0x55   :  { %p255_p11 = pnand %p253_p10, %p250_p9 }
  0x57   :  { %258 = shalt.err (!%p255_p11)
}
  0x58   :  { %107 = dma.vmem_to_hbm [thread:$0]  %s102_s17, 256, %s435_s4, [#allocation10], %s291_s30, %s291_s30, %s292_s6  }
  0x59   :  { %s259_s21 = scalar_lea.vmem %s394_s19, 256  ;;  %p264_p13 = scmp.lt.s32.totalorder %s394_s19, %s394_s19 }
  0x5a   :  { %p260_p12 = scmp.ne.s32.totalorder %s394_s19, %s259_s21  ;;  %p265_p0 = scmp.lt.s32.totalorder %s259_s21, %s259_s21 }
  0x5c   :  { %p266_p1 = por %p265_p0, %p264_p13 }
  0x5e   :  { %p267_p2 = pnand %p266_p1, %p260_p12 }
  0x60   :  { %270 = shalt.err (!%p267_p2)
}
  0x61   :  { %s271_s2 = scalar_lea.hbm %s436_s5, 256 }
  0x62   :  { %p272_p3 = scmp.ne.s32.totalorder %s436_s5, %s271_s2  ;;  %p275_p4 = scmp.lt.u32.totalorder %s271_s2, %s436_s5 }
  0x64   :  { %p277_p5 = pnand %p275_p4, %p272_p3 }
  0x66   :  { %280 = shalt.err (!%p277_p5)
}
  0x67   :  { %119 = dma.vmem_to_hbm [thread:$0]  %s394_s19, 256, %s436_s5, [#allocation10], %s291_s30, %s291_s30, %s292_s6  }
  0x68   :  { %285 = dma.done.wait [#allocation4], 256  }
  0x69   :  { %286 = vsyncadd [#allocation4], 4294967040 }
  0x6a   :  { %287 = dma.done.wait [#allocation10], 512  }
  0x6b   :  { %288 = vsyncadd [#allocation10], 4294966784 }
  0x6c   :  { %129 = vsyncpa [#allocation3], 1 }
  0x6d   :  { %130 = vsyncpa [#allocation6], 1 }
  0x6e   :  { %131 = vsyncpa [#allocation4], 1 }
  0x6f   :  { %132 = vsyncpa [#allocation10], 1 }

</bundles_post_ra>
